<compile_context>
chip_gen: v7x
topology: tpu7x:2x2x1
jax: 0.10.0
libtpu: 0.0.40
codegen_flags: <defaults>
</compile_context>

<pallas_src>
import math
import numpy as np
import jax
import jax.numpy as jnp
from jax.experimental import pallas as pl
from jax.experimental.pallas import tpu as pltpu

B, S, D = 2, 8, 32        # batch, sequence length, model dim
MAX_LEN = 64              # pe buffer length (torch default 5000; only :S is used)
DROPOUT_P = 0.1           # TODO(synk): nn.Dropout is identity in eval; training-mode
                          # stochastic masking (pltpu.prng_*) intentionally not applied here.


# ----------------------------- pe buffer (module __init__) -----------------------------

def build_pe_table(dim, max_len):
    """Exactly mirrors the torch buffer construction in PositionalEncoding.__init__."""
    position = jnp.arange(max_len, dtype=jnp.float32)[:, None]                     # (L, 1)
    div_term = jnp.exp(jnp.arange(0, dim, 2, dtype=jnp.float32)
                       * -(math.log(10000.0) / dim))                               # (dim/2,)
    ang = position * div_term[None, :]                                             # (L, dim/2)
    pe = jnp.zeros((max_len, dim), jnp.float32)
    pe = pe.at[:, 0::2].set(jnp.sin(ang))
    pe = pe.at[:, 1::2].set(jnp.cos(ang))
    return pe


# ----------------------------- kernel -----------------------------

def _posenc_kernel(emb_ref, pe_ref, out_ref):
    # emb_ref: (B, S, D)  pe_ref: (S, D)  out_ref: (B, S, D) — all fully VMEM-resident.
    scale = math.sqrt(emb_ref.shape[-1])                  # static: sqrt(self.dim)
    out_ref[...] = emb_ref[...] * scale + pe_ref[...][None, :, :]


# ----------------------------- wrapper -----------------------------

def positional_encoding(emb, pe_table, step=None):
    """emb: (B, S, D) float32.  pe_table: (max_len, D).  Returns (B, S, D)."""
    b, s, d = emb.shape
    if step:  # mirrors torch `if step:` (step=None or 0 -> positional branch)
        pe_slice = jnp.broadcast_to(pe_table[step][None, :], (s, d))
    else:
        pe_slice = pe_table[:s]

    return pl.pallas_call(
        _posenc_kernel,
        out_shape=jax.ShapeDtypeStruct((b, s, d), emb.dtype),
        grid_spec=pltpu.PrefetchScalarGridSpec(
            num_scalar_prefetch=0,
            grid=(1,),                                     # single step: whole batch per invocation
            in_specs=[
                pl.BlockSpec((b, s, d), lambda i: (0, 0, 0)),
                pl.BlockSpec((s, d), lambda i: (0, 0)),
            ],
            out_specs=pl.BlockSpec((b, s, d), lambda i: (0, 0, 0)),
        ),
        compiler_params=pltpu.CompilerParams(dimension_semantics=("arbitrary",)),
    )(emb, pe_slice)


# ----------------------------- test -----------------------------

if __name__ == "__main__":
    key = jax.random.PRNGKey(0)
    emb = jax.random.normal(key, (B, S, D), jnp.float32)
    pe_table = build_pe_table(D, MAX_LEN)

    # default path (step=None)
    out = positional_encoding(emb, pe_table)
    jax.block_until_ready(out)
    ref = emb * math.sqrt(D) + pe_table[:S][None]
    np.testing.assert_allclose(np.asarray(out), np.asarray(ref),
                               atol=1e-6, rtol=1e-6, err_msg="posenc (step=None)")

    # decode-step path (step=3)
    out_step = positional_encoding(emb, pe_table, step=3)
    jax.block_until_ready(out_step)
    ref_step = emb * math.sqrt(D) + pe_table[3][None, None, :]
    np.testing.assert_allclose(np.asarray(out_step), np.asarray(ref_step),
                               atol=1e-6, rtol=1e-6, err_msg="posenc (step=3)")

    print("KERNEL_OK")
</pallas_src>

<mosaic_0001>
module attributes {stable_mosaic.version = 11 : i64} {
  func.func @_posenc_kernel(%arg0: i32, %arg1: memref<2x8x32xf32, #tpu.memory_space<vmem>>, %arg2: memref<8x32xf32, #tpu.memory_space<vmem>>, %arg3: memref<2x8x32xf32, #tpu.memory_space<vmem>>) attributes {dimension_semantics = [#tpu.dimension_semantics<arbitrary>], iteration_bounds = array<i64: 1>, scalar_prefetch = 0 : i64, scratch_operands = 0 : i64, tpu.core_type = #tpu.core_type<tc>, window_params = [{pipeline_mode = #tpu.pipeline_mode<synchronous>, transform_indices = @transform_0, window_bounds = array<i64: 2, 8, 32>}, {pipeline_mode = #tpu.pipeline_mode<synchronous>, transform_indices = @transform_1, window_bounds = array<i64: 8, 32>}, {pipeline_mode = #tpu.pipeline_mode<synchronous>, transform_indices = @transform_2, window_bounds = array<i64: 2, 8, 32>}]} {
    %c0 = arith.constant 0 : index
    %c0_0 = arith.constant 0 : index
    %c0_1 = arith.constant 0 : index
    %0 = vector.load %arg1[%c0, %c0_0, %c0_1] : memref<2x8x32xf32, #tpu.memory_space<vmem>>, vector<2x8x32xf32>
    %cst = arith.constant 5.65685415 : f32
    %1 = vector.broadcast %cst : f32 to vector<2x8x32xf32>
    %2 = arith.mulf %0, %1 : vector<2x8x32xf32>
    %c0_2 = arith.constant 0 : index
    %c0_3 = arith.constant 0 : index
    %3 = vector.load %arg2[%c0_2, %c0_3] : memref<8x32xf32, #tpu.memory_space<vmem>>, vector<8x32xf32>
    %4 = vector.shape_cast %3 : vector<8x32xf32> to vector<1x8x32xf32>
    %5 = vector.broadcast %4 : vector<1x8x32xf32> to vector<2x8x32xf32>
    %6 = arith.addf %2, %5 : vector<2x8x32xf32>
    %c0_4 = arith.constant 0 : index
    %c0_5 = arith.constant 0 : index
    %c0_6 = arith.constant 0 : index
    %7 = vector.load %arg3[%c0_4, %c0_5, %c0_6] : memref<2x8x32xf32, #tpu.memory_space<vmem>>, vector<2x8x32xf32>
    tpu.vector_store %arg3[%c0_4, %c0_5, %c0_6], %6 {strides = array<i32>} : memref<2x8x32xf32, #tpu.memory_space<vmem>>, vector<2x8x32xf32>,
    return
  }
  func.func @transform_0(%arg0: i32) -> (i32, i32, i32) {
    %c0_i32 = arith.constant 0 : i32
    %c0_i32_0 = arith.constant 0 : i32
    %c0_i32_1 = arith.constant 0 : i32
    %c0_i32_2 = arith.constant 0 : i32
    return %c0_i32, %c0_i32_0, %c0_i32_1 : i32, i32, i32
  }
  func.func @transform_1(%arg0: i32) -> (i32, i32) {
    %c0_i32 = arith.constant 0 : i32
    %c0_i32_0 = arith.constant 0 : i32
    %c0_i32_1 = arith.constant 0 : i32
    return %c0_i32, %c0_i32_0 : i32, i32
  }
  func.func @transform_2(%arg0: i32) -> (i32, i32, i32) {
    %c0_i32 = arith.constant 0 : i32
    %c0_i32_0 = arith.constant 0 : i32
    %c0_i32_1 = arith.constant 0 : i32
    %c0_i32_2 = arith.constant 0 : i32
    return %c0_i32, %c0_i32_0, %c0_i32_1 : i32, i32, i32
  }
}

</mosaic_0001>

<bundles_post_ra>
// kernel: tpu_custom_call.1
= control target key start
LH: loop header
LB: loop body
LE: loop exit
PB: predicated region body
PF: predicated region fallthrough
CT: control target
= control target key end

     0   :  { %7 = vsyncpa [#allocation3], 0  ;;  %s205_s0 = inlined_call_operand.hbm [shape: f32[2,8,32], index: 0, kind: input, shape index: {}]   ;;  %s206_s1 = inlined_call_operand.hbm [shape: f32[8,32], index: 1, kind: input, shape index: {}]   ;;  %s207_s2 = inlined_call_operand.hbm [shape: f32[2,8,32], index: 2, kind: output, shape index: {}]  }
   0x1   :  { %8 = vsyncpa [#allocation6], 0 }
   0x2   :  { %9 = vsyncpa [#allocation4], 0  ;;  %s143_s9 = smov [#allocation2]   ;;  %s71_s13 = scalar_lea.hbm %s205_s0, 256 }
   0x3   :  { %s15_s10 = sshll.u32 %s143_s9, 4  ;;  %p72_p0 = scmp.ne.s32.totalorder %s205_s0, %s71_s13  ;;  %s16_s10 = int_to_ptr.vmem [resolvable:$true] %s15_s10 }
   0x4   :  { %p75_p1 = scmp.lt.u32.totalorder %s71_s13, %s205_s0 }
   0x6   :  { %p77_p2 = pnand %p75_p1, %p72_p0 }
   0x8   :  { %80 = shalt.err (!%p77_p2)
}
   0x9   :  { %s81_s18 = scalar_lea.vmem %s16_s10, 256  ;;  %p86_p4 = scmp.lt.s32.totalorder %s16_s10, %s16_s10 }
   0xa   :  { %p82_p3 = scmp.ne.s32.totalorder %s16_s10, %s81_s18  ;;  %p87_p5 = scmp.lt.s32.totalorder %s81_s18, %s81_s18 }
   0xc   :  { %p88_p6 = por %p87_p5, %p86_p4 }
   0xe   :  { %p89_p7 = pnand %p88_p6, %p82_p3 }
  0x10   :  { %92 = shalt.err (!%p89_p7)
}
  0x11   :  { %s144_s19 = smov 128   ;;  %s145_s20 = smov 8  }
  0x12   :  { %21 = dma.hbm_to_vmem [thread:$0]  %s205_s0, 256, %s16_s10, [#allocation3], %s144_s19, %s144_s19, %s145_s20  }
  0x13   :  { %s146_s23 = smov [#allocation5]   ;;  %s93_s27 = scalar_lea.hbm %s206_s1, 128 }
  0x14   :  { %s28_s24 = sshll.u32 %s146_s23, 4  ;;  %p94_p8 = scmp.ne.s32.totalorder %s206_s1, %s93_s27  ;;  %s29_s24 = int_to_ptr.vmem [resolvable:$true] %s28_s24 }
  0x15   :  { %p97_p9 = scmp.lt.u32.totalorder %s93_s27, %s206_s1 }
  0x17   :  { %p99_p10 = pnand %p97_p9, %p94_p8 }
  0x19   :  { %102 = shalt.err (!%p99_p10)
}
  0x1a   :  { %s103_s4 = scalar_lea.vmem %s29_s24, 128  ;;  %p108_p12 = scmp.lt.s32.totalorder %s29_s24, %s29_s24 }
  0x1b   :  { %p104_p11 = scmp.ne.s32.totalorder %s29_s24, %s103_s4  ;;  %p109_p13 = scmp.lt.s32.totalorder %s103_s4, %s103_s4 }
  0x1d   :  { %p110_p0 = por %p109_p13, %p108_p12 }
  0x1f   :  { %p111_p1 = pnand %p110_p0, %p104_p11 }
  0x21   :  { %114 = shalt.err (!%p111_p1)
}
  0x22   :  { %31 = dma.hbm_to_vmem [thread:$0]  %s206_s1, 128, %s29_s24, [#allocation6]  }
  0x23   :  { %137 = dma.done.wait [#allocation3], 256  }
  0x24   :  { %138 = vsyncadd [#allocation3], 4294967040 }
  0x25   :  { %139 = dma.done.wait [#allocation6], 128  }
  0x26   :  { %140 = vsyncadd [#allocation6], 4294967168  ;;  %v38_v0 = vld [vmem:[#allocation2] sm:$0xff]  ;;  %v42_v1 = vld [vmem:[#allocation5] sm:$0xff]  ;;  %s147_s6 = smov [#allocation7]   ;;  %vm45_vm0 = vcmask 261120  }
  0x27   :  { %v39_v2 = vld [vmem:[#allocation2 + $0x8] sm:$0xff]  ;;  %s53_s7 = sshll.u32 %s147_s6, 4  ;;  %v40_v3 = vmul.f32 5.656854, %v38_v0  ;;  %s54_s7 = int_to_ptr.vmem [resolvable:$true] %s53_s7 }
  0x28   :  { %v41_v4 = vmul.f32 5.656854, %v39_v2  ;;  %s115_s8 = scalar_lea.vmem %s54_s7, 256  ;;  %p120_p3 = scmp.lt.s32.totalorder %s54_s7, %s54_s7 }
  0x29   :  { %v43_v5 = vadd.f32 %v42_v1, %v40_v3  ;;  %p116_p2 = scmp.ne.s32.totalorder %s54_s7, %s115_s8  ;;  %p121_p4 = scmp.lt.s32.totalorder %s115_s8, %s115_s8 }
  0x2a   :  { %v44_v6 = vadd.f32 %v42_v1, %v41_v4 }
  0x2b   :  { %46 = vst.msk [vmem:[#allocation7] sm:$0xff] %vm45_vm0, %v43_v5  ;;  %p122_p5 = por %p121_p4, %p120_p3 }
  0x2c   :  { %47 = vst.msk [vmem:[#allocation7 + $0x8] sm:$0xff] %vm45_vm0, %v44_v6 }
  0x2d   :  { %p123_p6 = pnand %p122_p5, %p116_p2 }
  0x2f   :  { %126 = shalt.err (!%p123_p6)
}
  0x30   :  { %s127_s10 = scalar_lea.hbm %s207_s2, 256 }
  0x31   :  { %p128_p7 = scmp.ne.s32.totalorder %s207_s2, %s127_s10  ;;  %p131_p8 = scmp.lt.u32.totalorder %s127_s10, %s207_s2 }
  0x33   :  { %p133_p9 = pnand %p131_p8, %p128_p7 }
  0x35   :  { %136 = shalt.err (!%p133_p9)
}
  0x36   :  { %59 = dma.vmem_to_hbm [thread:$0]  %s54_s7, 256, %s207_s2, [#allocation4], %s144_s19, %s144_s19, %s145_s20  }
  0x37   :  { %141 = dma.done.wait [#allocation4], 256  }
  0x38   :  { %142 = vsyncadd [#allocation4], 4294967040 }
  0x39   :  { %63 = vsyncpa [#allocation3], 1 }
  0x3a   :  { %64 = vsyncpa [#allocation6], 1 }
  0x3b   :  { %65 = vsyncpa [#allocation4], 1 }

</bundles_post_ra>
